<compile_context>
chip_gen: v7x
topology: tpu7x:2x2x1
jax: 0.10.0
libtpu: 0.0.40
codegen_flags: <defaults>
</compile_context>

<pallas_src>
import functools

import jax
import jax.numpy as jnp
from jax.experimental import pallas as pl
from jax.experimental.pallas import tpu as pltpu


def _round_up(x: int, m: int) -> int:
    return -(-x // m) * m


def _vmem_capacity_bytes(default: int = 64 * 1024 * 1024) -> int:
    """Physical VMEM per TensorCore (64 MiB v7x, 128 MiB v5e/v6e); safe fallback."""
    try:
        info = pltpu.get_tpu_info()
        return int(getattr(info, "vmem_capacity_bytes", default))
    except Exception:  # not on a TPU backend at trace time, or API shape changed
        return default


# ----------------------------- Pallas kernel ------------------------------- #
def _snapshotter_kernel(snap_ref, upd_ref, x_ref, new_ref, *, state_size):
    """One grid step = one tile of (batch*channel) rows, full time axis on lanes.

    snap_ref : (R, T_s)           old snapshot rows
    upd_ref  : (R, T_u)           new streaming samples
    x_ref    : (R, T_s + T_u)     concatenated stream
    new_ref  : (R, state_size)    updated snapshot = last state_size samples of x

    Direct sliced stores only: no in-register concatenation (which would
    materialize a block-sized VMEM temp and re-read it for the tail slice).
    """
    t_s = snap_ref.shape[-1]
    t_u = upd_ref.shape[-1]

    # x = [snapshot | update]
    x_ref[:, :t_s] = snap_ref[...]
    x_ref[:, t_s:] = upd_ref[...]

    # new_snapshot = x[:, -state_size:]
    keep = state_size - t_u                 # samples carried over from the old snapshot
    if keep > 0:                            # static (shape-derived) branch
        new_ref[:, :keep] = snap_ref[:, t_s - keep:]
        new_ref[:, keep:] = upd_ref[...]
    else:
        # state_size <= t_u: the new snapshot comes entirely from the update tail.
        new_ref[...] = upd_ref[:, t_u - state_size:]


# ------------------------------ host wrapper -------------------------------- #
def background_snapshotter_forward(update, snapshot, *, state_size, row_tile=None):
    """Fused concat + tail-slice. update/snapshot: (..., T); returns (x, new_snapshot)."""
    if update.shape[:-1] != snapshot.shape[:-1]:
        raise ValueError("update / snapshot leading dims must match")
    lead = update.shape[:-1]
    t_u = int(update.shape[-1])
    t_s = int(snapshot.shape[-1])
    t_x = t_s + t_u
    if not (0 < state_size <= t_x):
        raise ValueError("state_size must satisfy 0 < state_size <= T_snapshot + T_update")

    # Promote to the common dtype (never silently down-cast the carried state).
    dtype = jnp.promote_types(update.dtype, snapshot.dtype)
    update = update.astype(dtype)
    snapshot = snapshot.astype(dtype)

    n_rows = 1
    for d in lead:
        n_rows *= int(d)
    upd2 = update.reshape(n_rows, t_u)
    snap2 = snapshot.reshape(n_rows, t_s)

    itemsize = jnp.dtype(dtype).itemsize
    pack = max(8, 32 // itemsize)            # sublane pack: f32->8, bf16->16, int8/fp8->32
    # Bytes moved per row per grid step (both inputs + both outputs, single copy).
    row_bytes = (t_s + t_u + t_x + state_size) * itemsize

    vmem_cap = _vmem_capacity_bytes()                     # 64 MiB/TC v7x, 128 MiB v5e/v6e
    vmem_limit = min(vmem_cap // 2, 64 * 1024 * 1024)     # 32 MiB v7x, 64 MiB v5e/v6e

    if row_tile is None:
        # Live block bytes per step ~= 2/5 of the scoped limit; the pipeline
        # double-buffers (x2), leaving ~20% headroom for compiler scratch.
        budget = (vmem_limit * 2) // 5
        row_tile = max(pack, budget // max(row_bytes, 1) // pack * pack)
        if n_rows > pack:
            # >= 2 row tiles whenever possible so both v7x TensorCores get work
            # on the "parallel" grid axis.
            half = _round_up(-(-n_rows // 2), pack)
            row_tile = min(row_tile, half)
        row_tile = min(row_tile, _round_up(n_rows, pack))
    if n_rows <= pack:
        # Tiny inputs: a full-extent (non-padded) sublane block is always legal.
        row_tile = min(row_tile, n_rows)
    row_tile = max(1, int(row_tile))

    # Make sure the scoped VMEM limit covers the double-buffered working set.
    needed = 2 * row_tile * row_bytes + (2 << 20)
    vmem_limit = int(min(max(vmem_limit, needed), max(vmem_cap - (4 << 20), 32 << 20)))

    grid = (pl.cdiv(n_rows, row_tile),)

    # The new snapshot is byte-for-byte the tail of x; when old and new snapshots
    # have the same shape (the steady-state streaming case) alias them so a
    # caller that donates its state buffer gets an in-place update.
    io_aliases = {0: 1} if t_s == state_size else {}

    kernel = functools.partial(_snapshotter_kernel, state_size=state_size)
    x2, new2 = pl.pallas_call(
        kernel,
        out_shape=(jax.ShapeDtypeStruct((n_rows, t_x), dtype),
                   jax.ShapeDtypeStruct((n_rows, state_size), dtype)),
        grid=grid,
        in_specs=[
            pl.BlockSpec((row_tile, t_s), lambda i: (i, 0)),
            pl.BlockSpec((row_tile, t_u), lambda i: (i, 0)),
        ],
        out_specs=(
            pl.BlockSpec((row_tile, t_x), lambda i: (i, 0)),
            pl.BlockSpec((row_tile, state_size), lambda i: (i, 0)),
        ),
        input_output_aliases=io_aliases,
        compiler_params=pltpu.CompilerParams(
            dimension_semantics=("parallel",),
            vmem_limit_bytes=vmem_limit),
    )(snap2, upd2)

    return x2.reshape(lead + (t_x,)), new2.reshape(lead + (state_size,))


class BackgroundSnapshotter:
    """Update a kernel with a new piece of streaming data (JAX/Pallas port)."""

    def __init__(self, psd_length, kernel_length, fduration,
                 sample_rate, inference_sampling_rate):
        state_length = kernel_length + fduration + psd_length
        state_length -= 1.0 / inference_sampling_rate
        self.state_size = int(state_length * sample_rate)

    def __call__(self, update, snapshot):
        return background_snapshotter_forward(
            update, snapshot, state_size=self.state_size)


# ---------------------------------- demo ------------------------------------ #
if __name__ == "__main__":
    # Small deterministic example consistent with the module:
    #   psd_length=2 s, kernel_length=1 s, fduration=1 s, sample_rate=32 Hz,
    #   inference_sampling_rate=4 Hz -> state_size = int(3.75 * 32) = 120
    #   update = one inference step = sample_rate / inference_sampling_rate = 8 samples
    #   update: (batch=2, channels=3, 8), snapshot: (2, 3, 120)
    snapshotter = BackgroundSnapshotter(
        psd_length=2.0, kernel_length=1.0, fduration=1.0,
        sample_rate=32.0, inference_sampling_rate=4.0)
    state_size = snapshotter.state_size                       # 120
    update_size = int(32.0 / 4.0)                             # 8
    batch, channels = 2, 3

    key = jax.random.PRNGKey(0)
    k_u, k_s = jax.random.split(key)
    update = jax.random.normal(k_u, (batch, channels, update_size), dtype=jnp.float32)
    snapshot = jax.random.normal(k_s, (batch, channels, state_size), dtype=jnp.float32)

    fwd = jax.jit(snapshotter.__call__)
    x, new_snapshot = fwd(update, snapshot)
    jax.block_until_ready((x, new_snapshot))

    assert x.shape == (batch, channels, state_size + update_size)
    assert new_snapshot.shape == (batch, channels, state_size)

    # Reference: plain concat + slice (must be bit-exact; pure data movement).
    ref_x = jnp.concatenate([snapshot, update], axis=-1)
    ref_snap = ref_x[..., -state_size:]
    assert bool(jnp.all(x == ref_x)), "x mismatch vs concat reference"
    assert bool(jnp.all(new_snapshot == ref_snap)), "snapshot mismatch vs slice reference"

    print("KERNEL_OK")
</pallas_src>

<mosaic_0001>
module attributes {stable_mosaic.version = 11 : i64} {
  func.func @_snapshotter_kernel(%arg0: i32, %arg1: memref<6x120xf32, #tpu.memory_space<vmem>>, %arg2: memref<6x8xf32, #tpu.memory_space<vmem>>, %arg3: memref<6x128xf32, #tpu.memory_space<vmem>>, %arg4: memref<6x120xf32, #tpu.memory_space<vmem>>) attributes {dimension_semantics = [#tpu.dimension_semantics<parallel>], iteration_bounds = array<i64: 1>, scalar_prefetch = 0 : i64, scratch_operands = 0 : i64, tpu.core_type = #tpu.core_type<tc>, window_params = [{transform_indices = @transform_0, window_bounds = array<i64: 6, 120>}, {transform_indices = @transform_1, window_bounds = array<i64: 6, 8>}, {transform_indices = @transform_2, window_bounds = array<i64: 6, 128>}, {transform_indices = @transform_3, window_bounds = array<i64: 6, 120>}]} {
    %c0 = arith.constant 0 : index
    %c0_0 = arith.constant 0 : index
    %0 = vector.load %arg1[%c0, %c0_0] : memref<6x120xf32, #tpu.memory_space<vmem>>, vector<6x120xf32>
    %c0_1 = arith.constant 0 : index
    %c0_2 = arith.constant 0 : index
    %1 = vector.load %arg3[%c0_1, %c0_2] : memref<6x128xf32, #tpu.memory_space<vmem>>, vector<6x120xf32>
    tpu.vector_store %arg3[%c0_1, %c0_2], %0 {strides = array<i32>} : memref<6x128xf32, #tpu.memory_space<vmem>>, vector<6x120xf32>,
    %c0_3 = arith.constant 0 : index
    %c0_4 = arith.constant 0 : index
    %2 = vector.load %arg2[%c0_3, %c0_4] : memref<6x8xf32, #tpu.memory_space<vmem>>, vector<6x8xf32>
    %c0_5 = arith.constant 0 : index
    %c120 = arith.constant 120 : index
    %3 = vector.load %arg3[%c0_5, %c120] : memref<6x128xf32, #tpu.memory_space<vmem>>, vector<6x8xf32>
    tpu.vector_store %arg3[%c0_5, %c120], %2 {strides = array<i32>} : memref<6x128xf32, #tpu.memory_space<vmem>>, vector<6x8xf32>,
    %c0_6 = arith.constant 0 : index
    %c8 = arith.constant 8 : index
    %4 = vector.load %arg1[%c0_6, %c8] : memref<6x120xf32, #tpu.memory_space<vmem>>, vector<6x112xf32>
    %c0_7 = arith.constant 0 : index
    %c0_8 = arith.constant 0 : index
    %5 = vector.load %arg4[%c0_7, %c0_8] : memref<6x120xf32, #tpu.memory_space<vmem>>, vector<6x112xf32>
    tpu.vector_store %arg4[%c0_7, %c0_8], %4 {strides = array<i32>} : memref<6x120xf32, #tpu.memory_space<vmem>>, vector<6x112xf32>,
    %c0_9 = arith.constant 0 : index
    %c0_10 = arith.constant 0 : index
    %6 = vector.load %arg2[%c0_9, %c0_10] : memref<6x8xf32, #tpu.memory_space<vmem>>, vector<6x8xf32>
    %c0_11 = arith.constant 0 : index
    %c112 = arith.constant 112 : index
    %7 = vector.load %arg4[%c0_11, %c112] : memref<6x120xf32, #tpu.memory_space<vmem>>, vector<6x8xf32>
    tpu.vector_store %arg4[%c0_11, %c112], %6 {strides = array<i32>} : memref<6x120xf32, #tpu.memory_space<vmem>>, vector<6x8xf32>,
    return
  }
  func.func @transform_0(%arg0: i32) -> (i32, i32) {
    %c0_i32 = arith.constant 0 : i32
    %c0_i32_0 = arith.constant 0 : i32
    return %arg0, %c0_i32 : i32, i32
  }
  func.func @transform_1(%arg0: i32) -> (i32, i32) {
    %c0_i32 = arith.constant 0 : i32
    %c0_i32_0 = arith.constant 0 : i32
    return %arg0, %c0_i32 : i32, i32
  }
  func.func @transform_2(%arg0: i32) -> (i32, i32) {
    %c0_i32 = arith.constant 0 : i32
    %c0_i32_0 = arith.constant 0 : i32
    return %arg0, %c0_i32 : i32, i32
  }
  func.func @transform_3(%arg0: i32) -> (i32, i32) {
    %c0_i32 = arith.constant 0 : i32
    %c0_i32_0 = arith.constant 0 : i32
    return %arg0, %c0_i32 : i32, i32
  }
}

</mosaic_0001>

<bundles_post_ra>
// kernel: a_call__.1
= control target key start
LH: loop header
LB: loop body
LE: loop exit
PB: predicated region body
PF: predicated region fallthrough
CT: control target
= control target key end

     0   :  { %vm14_vm0 = vcmask 979968   ;;  %s47_s18 = smov 120   ;;  %s48_s21 = smov 112   ;;  %vm28_vm1 = vcmask 914432   ;;  %vm35_vm2 = vcmask 980864   ;;  %vm21_vm3 = vcmask 1046464   ;;  %s93_s0 = inlined_call_operand.vmem [shape: f32[6,120], index: 0, kind: input, shape index: {}, may-alias: {0,3}]   ;;  %s94_s2 = inlined_call_operand.vmem [shape: f32[6,128], index: 2, kind: output, shape index: {0}]   ;;  %s95_s1 = inlined_call_operand.vmem [shape: f32[6,8], index: 1, kind: input, shape index: {}]   ;;  %s96_s3 = inlined_call_operand.vmem [shape: f32[6,120], index: 3, kind: output, shape index: {1}, may-alias: {0,3}]  }
   0x1   :  { %v23_v0 = vld [vmem:[%s93_s0] sm:$0x3f] }
   0x2   :  { %v13_v1 = vld [vmem:[%s93_s0] sm:$0x3f]  ;;  %25 = vrot.lane.b32.xlu0 %v23_v0, %s47_s18 }
   0x3   :  { %v30_v2 = vld [vmem:[%s95_s1] sm:$0x3f]  ;;  %15 = vst.msk [vmem:[%s94_s2] sm:$0x3f] %vm14_vm0, %v13_v1 }
   0x4   :  { %32 = vrot.lane.b32.xlu1 %v30_v2, %s48_s21  ;;  %v16_v3 = vld [vmem:[%s95_s1] sm:$0x3f] }
   0x6   :  { %18 = vrot.lane.b32.xlu0 %v16_v3, %s47_s18 }
  0x74   :  { %v26_v4 = vpop.permute.xlu0 %25 }
  0x75   :  { %29 = vst.msk [vmem:[%s96_s3] sm:$0x3f] %vm28_vm1, %v26_v4 }
  0x76   :  { %v33_v5 = vpop.permute.xlu1 %32 }
  0x77   :  { %36 = vst.msk [vmem:[%s96_s3] sm:$0x3f] %vm35_vm2, %v33_v5 }
  0x78   :  { %v19_v6 = vpop.permute.xlu0 %18 }
  0x79   :  { %22 = vst.msk [vmem:[%s94_s2] sm:$0x3f] %vm21_vm3, %v19_v6 }

</bundles_post_ra>
